<compile_context>
chip_gen: v7x
topology: tpu7x:2x2x1
jax: 0.10.0
libtpu: 0.0.40
codegen_flags: <defaults>
</compile_context>

<pallas_src>
import jax
import jax.numpy as jnp
from jax import lax
from jax.experimental import pallas as pl
from jax.experimental.pallas import tpu as pltpu


def _contrastive_rowsum_kernel(
    zi_hi_ref, zi_lo_ref, zj_hi_ref, zj_lo_ref,   # row tiles of scaled z_i / z_j (bf16 hi/lo)
    c_hi_ref, c_lo_ref,                           # column tile of concat(z_i, z_j) (bf16 hi/lo)
    acc_i_ref, acc_j_ref,                         # (tm, 128) f32 resident accumulators (outputs)
):
    j = pl.program_id(1)

    @pl.when(j == 0)
    def _():
        acc_i_ref[...] = jnp.zeros_like(acc_i_ref)
        acc_j_ref[...] = jnp.zeros_like(acc_j_ref)

    dn = (((1,), (1,)), ((), ()))   # contract dim 1 vs dim 1 -> A @ C^T, no transpose
    c_hi = c_hi_ref[...]
    c_lo = c_lo_ref[...]

    def scaled_sim(r_hi, r_lo):
        # bf16x3: ~f32-accurate A @ C^T from three bf16 MXU passes (lo@lo dropped),
        # accumulated in f32.  Operands already carry the sqrt(1/T) scale, so this
        # IS sim / temperature.
        s = lax.dot_general(r_hi, c_hi, dn, preferred_element_type=jnp.float32)
        s = s + lax.dot_general(r_hi, c_lo, dn, preferred_element_type=jnp.float32)
        s = s + lax.dot_general(r_lo, c_hi, dn, preferred_element_type=jnp.float32)
        return s

    e_i = jnp.exp(scaled_sim(zi_hi_ref[...], zi_lo_ref[...]))   # (tm, tk)
    e_j = jnp.exp(scaled_sim(zj_hi_ref[...], zj_lo_ref[...]))   # (tm, tk)

    # Lane-dense accumulation: fold the tk columns onto 128 lanes with VPU adds
    # (lane-aligned static slices; the single cross-lane reduce happens once in
    # the wrapper, not per grid step).
    groups = e_i.shape[1] // 128
    if groups <= 1:
        acc_i_ref[...] += e_i
        acc_j_ref[...] += e_j
    else:
        for g in range(groups):
            sl = slice(g * 128, (g + 1) * 128)
            acc_i_ref[...] += e_i[:, sl]
            acc_j_ref[...] += e_j[:, sl]


def _round_up(x, m):
    return ((x + m - 1) // m) * m


def _pick_tiles(B, d_p):
    # Row tile tm / padded batch b_p / column tile tk (over the 2*b_p concat axis).
    if B <= 128:
        tm = _round_up(B, 64)        # keeps 2*b_p a multiple of 128 (lane-dense acc)
        b_p = tm
    elif B <= 512:
        tm = 128                     # >= 2 row tiles -> "parallel" axis can shard
        b_p = _round_up(B, tm)       # across v7x's 2 TensorCores
    else:
        tm = 256
        b_p = _round_up(B, tm)
    n_cols = 2 * b_p                 # always a multiple of 128
    budget = 24 * 1024 * 1024        # working-set cap, safe on v5e/v6e/v7x
    tk = 128
    for cand in (1024, 512, 256, 128):
        if n_cols % cand == 0:
            est = (2 * (4 * tm * d_p * 2)        # 4 bf16 row arrays, double-buffered
                   + 2 * (2 * cand * d_p * 2)    # 2 bf16 column arrays, double-buffered
                   + 2 * 4 * tm * cand           # e_i / e_j f32 intermediates
                   + 2 * 2 * 4 * tm * 128)       # 2 f32 accumulator outputs, double-buffered
            if est <= budget:
                tk = cand
                break
    return tm, b_p, tk


def _split_bf16(x):
    # bf16x3 operand split: x ~= hi + lo with hi, lo in bf16.
    hi = x.astype(jnp.bfloat16)
    lo = (x - hi.astype(jnp.float32)).astype(jnp.bfloat16)
    return hi, lo


def contrastive_loss(emb_i, emb_j, batch_size, temperature=0.5):
    B, D = emb_i.shape
    assert B == batch_size and emb_j.shape == (B, D)

    inv_temp = 1.0 / float(temperature)
    sqrt_it = float(inv_temp) ** 0.5
    eps = 1e-12   # F.normalize eps

    # --- Hoisted (once, in the wrapper): L2-normalize and fold sqrt(1/T) in. ---
    def norm_scale(x):
        x = x.astype(jnp.float32)
        n = jnp.sqrt(jnp.sum(x * x, axis=1, keepdims=True))
        return x / jnp.maximum(n, eps) * sqrt_it

    zi_s = norm_scale(emb_i)    # (B, D);  zi_s . zj_s == sim / T
    zj_s = norm_scale(emb_j)

    d_p = _round_up(D, 128)                 # lane-align D (zero pad is norm/dot neutral)
    tm, b_p, tk = _pick_tiles(B, d_p)

    def pad(x):
        return jnp.zeros((b_p, d_p), jnp.float32).at[:B, :D].set(x)

    zi_p = pad(zi_s)
    zj_p = pad(zj_s)
    c_p = jnp.concatenate([zi_p, zj_p], axis=0)     # (2*b_p, d_p) single column operand

    zi_hi, zi_lo = _split_bf16(zi_p)
    zj_hi, zj_lo = _split_bf16(zj_p)
    c_hi, c_lo = _split_bf16(c_p)

    grid = (b_p // tm, (2 * b_p) // tk)

    acc_i, acc_j = pl.pallas_call(
        _contrastive_rowsum_kernel,
        out_shape=(jax.ShapeDtypeStruct((b_p, 128), jnp.float32),
                   jax.ShapeDtypeStruct((b_p, 128), jnp.float32)),
        grid_spec=pltpu.PrefetchScalarGridSpec(
            num_scalar_prefetch=0,
            grid=grid,
            in_specs=[
                pl.BlockSpec((tm, d_p), lambda i, j: (i, 0)),   # z_i hi row tile
                pl.BlockSpec((tm, d_p), lambda i, j: (i, 0)),   # z_i lo row tile
                pl.BlockSpec((tm, d_p), lambda i, j: (i, 0)),   # z_j hi row tile
                pl.BlockSpec((tm, d_p), lambda i, j: (i, 0)),   # z_j lo row tile
                pl.BlockSpec((tk, d_p), lambda i, j: (j, 0)),   # concat column hi tile
                pl.BlockSpec((tk, d_p), lambda i, j: (j, 0)),   # concat column lo tile
            ],
            out_specs=(
                pl.BlockSpec((tm, 128), lambda i, j: (i, 0)),   # resident accumulator (half i)
                pl.BlockSpec((tm, 128), lambda i, j: (i, 0)),   # resident accumulator (half j)
            ),
        ),
        compiler_params=pltpu.CompilerParams(
            dimension_semantics=("parallel", "arbitrary"),
            vmem_limit_bytes=48 * 1024 * 1024,
        ),
    )(zi_hi, zi_lo, zj_hi, zj_lo, c_hi, c_lo)

    # --- O(B)/O(B*D) epilogue in plain JAX (exact f32); padded rows never reach log. ---
    sum_i = jnp.sum(acc_i[:B], axis=1)      # rowsum of exp(sim/T) over all 2*b_p columns
    sum_j = jnp.sum(acc_j[:B], axis=1)
    pad_cols = 2.0 * float(b_p - B)         # each zero-padded column contributed exp(0) = 1
    pos_t = jnp.sum(zi_s * zj_s, axis=1)                # positives / T (exact)
    diag_i = jnp.exp(jnp.sum(zi_s * zi_s, axis=1))      # exp(sim_rr / T), exact per row
    diag_j = jnp.exp(jnp.sum(zj_s * zj_s, axis=1))      # (handles all-zero rows too)
    nom = jnp.exp(pos_t)
    den_i = sum_i - diag_i - pad_cols
    den_j = sum_j - diag_j - pad_cols
    # -log(nom / (nom + den)) == log(nom + den) - positives/T
    loss = jnp.sum(jnp.log(nom + den_i) - pos_t) + jnp.sum(jnp.log(nom + den_j) - pos_t)
    return loss / (2.0 * B)


def _reference_loss(emb_i, emb_j, batch_size, temperature=0.5):
    B = batch_size
    zi = emb_i / jnp.maximum(jnp.linalg.norm(emb_i, axis=1, keepdims=True), 1e-12)
    zj = emb_j / jnp.maximum(jnp.linalg.norm(emb_j, axis=1, keepdims=True), 1e-12)
    z = jnp.concatenate([zi, zj], axis=0)
    n = z.shape[0]
    sim = z @ z.T
    idx = jnp.arange(n)
    positives = sim[idx, (idx + B) % n]
    nominator = jnp.exp(positives / temperature)
    neg_mask = 1.0 - jnp.eye(n, dtype=jnp.float32)
    denominator = jnp.sum(neg_mask * jnp.exp(sim / temperature), axis=1)
    loss_partial = -jnp.log(nominator / (nominator + denominator))
    return jnp.sum(loss_partial) / (2 * B)


if __name__ == "__main__":
    # Module __init__: batch_size, temperature buffer (0.5), negatives_mask buffer
    # (~eye(2B)) -- the mask is handled analytically (diagonal subtraction).
    B, D = 4, 32
    temperature = 0.5

    key = jax.random.PRNGKey(0)
    k1, k2 = jax.random.split(key)
    emb_i = jax.random.normal(k1, (B, D), dtype=jnp.float32)
    emb_j = jax.random.normal(k2, (B, D), dtype=jnp.float32)

    loss = contrastive_loss(emb_i, emb_j, batch_size=B, temperature=temperature)
    loss = jax.block_until_ready(loss)

    expected = _reference_loss(emb_i, emb_j, batch_size=B, temperature=temperature)
    # bf16x3 matmul typically lands within ~1e-6 of the f32 reference; 1e-4 is a
    # comfortable bound.
    assert jnp.allclose(loss, expected, rtol=1e-4, atol=1e-4), (loss, expected)

    print("KERNEL_OK")
</pallas_src>

<mosaic_0001>
module attributes {stable_mosaic.version = 11 : i64} {
  func.func @_contrastive_rowsum_kernel(%arg0: i32, %arg1: i32, %arg2: memref<64x128xbf16, #tpu.memory_space<vmem>>, %arg3: memref<64x128xbf16, #tpu.memory_space<vmem>>, %arg4: memref<64x128xbf16, #tpu.memory_space<vmem>>, %arg5: memref<64x128xbf16, #tpu.memory_space<vmem>>, %arg6: memref<128x128xbf16, #tpu.memory_space<vmem>>, %arg7: memref<128x128xbf16, #tpu.memory_space<vmem>>, %arg8: memref<64x128xf32, #tpu.memory_space<vmem>>, %arg9: memref<64x128xf32, #tpu.memory_space<vmem>>) attributes {dimension_semantics = [#tpu.dimension_semantics<parallel>, #tpu.dimension_semantics<arbitrary>], iteration_bounds = array<i64: 1, 1>, scalar_prefetch = 0 : i64, scratch_operands = 0 : i64, tpu.core_type = #tpu.core_type<tc>, window_params = [{transform_indices = @transform_0, window_bounds = array<i64: 64, 128>}, {transform_indices = @transform_1, window_bounds = array<i64: 64, 128>}, {transform_indices = @transform_2, window_bounds = array<i64: 64, 128>}, {transform_indices = @transform_3, window_bounds = array<i64: 64, 128>}, {transform_indices = @transform_4, window_bounds = array<i64: 128, 128>}, {transform_indices = @transform_5, window_bounds = array<i64: 128, 128>}, {transform_indices = @transform_6, window_bounds = array<i64: 64, 128>}, {transform_indices = @transform_7, window_bounds = array<i64: 64, 128>}]} {
    %c0_i32 = arith.constant 0 : i32
    %0 = arith.cmpi eq, %arg1, %c0_i32 : i32
    %1 = arith.extui %0 : i1 to i32
    %c0_i32_0 = arith.constant 0 : i32
    %2 = arith.cmpi ne, %1, %c0_i32_0 : i32
    scf.if %2 {
      %cst_25 = arith.constant 0.000000e+00 : f32
      %27 = vector.broadcast %cst_25 : f32 to vector<64x128xf32>
      %c0_26 = arith.constant 0 : index
      %c0_27 = arith.constant 0 : index
      %28 = vector.load %arg8[%c0_26, %c0_27] : memref<64x128xf32, #tpu.memory_space<vmem>>, vector<64x128xf32>
      tpu.vector_store %arg8[%c0_26, %c0_27], %27 {strides = array<i32>} : memref<64x128xf32, #tpu.memory_space<vmem>>, vector<64x128xf32>,
      %cst_28 = arith.constant 0.000000e+00 : f32
      %29 = vector.broadcast %cst_28 : f32 to vector<64x128xf32>
      %c0_29 = arith.constant 0 : index
      %c0_30 = arith.constant 0 : index
      %30 = vector.load %arg9[%c0_29, %c0_30] : memref<64x128xf32, #tpu.memory_space<vmem>>, vector<64x128xf32>
      tpu.vector_store %arg9[%c0_29, %c0_30], %29 {strides = array<i32>} : memref<64x128xf32, #tpu.memory_space<vmem>>, vector<64x128xf32>,
    } else {
    }
    %c0 = arith.constant 0 : index
    %c0_1 = arith.constant 0 : index
    %3 = vector.load %arg6[%c0, %c0_1] : memref<128x128xbf16, #tpu.memory_space<vmem>>, vector<128x128xbf16>
    %c0_2 = arith.constant 0 : index
    %c0_3 = arith.constant 0 : index
    %4 = vector.load %arg7[%c0_2, %c0_3] : memref<128x128xbf16, #tpu.memory_space<vmem>>, vector<128x128xbf16>
    %c0_4 = arith.constant 0 : index
    %c0_5 = arith.constant 0 : index
    %5 = vector.load %arg2[%c0_4, %c0_5] : memref<64x128xbf16, #tpu.memory_space<vmem>>, vector<64x128xbf16>
    %c0_6 = arith.constant 0 : index
    %c0_7 = arith.constant 0 : index
    %6 = vector.load %arg3[%c0_6, %c0_7] : memref<64x128xbf16, #tpu.memory_space<vmem>>, vector<64x128xbf16>
    %cst = arith.constant dense<0.000000e+00> : vector<64x128xf32>
    %7 = tpu.matmul %5, %3, %cst {dimension_numbers = #tpu.dot_dimension_numbers<[1], [1], [0], [0], [0, 0, 1, 0], [], []>} : vector<64x128xbf16>, vector<128x128xbf16>, vector<64x128xf32> -> vector<64x128xf32>
    %cst_8 = arith.constant dense<0.000000e+00> : vector<64x128xf32>
    %8 = tpu.matmul %5, %4, %cst_8 {dimension_numbers = #tpu.dot_dimension_numbers<[1], [1], [0], [0], [0, 0, 1, 0], [], []>} : vector<64x128xbf16>, vector<128x128xbf16>, vector<64x128xf32> -> vector<64x128xf32>
    %9 = arith.addf %7, %8 : vector<64x128xf32>
    %cst_9 = arith.constant dense<0.000000e+00> : vector<64x128xf32>
    %10 = tpu.matmul %6, %3, %cst_9 {dimension_numbers = #tpu.dot_dimension_numbers<[1], [1], [0], [0], [0, 0, 1, 0], [], []>} : vector<64x128xbf16>, vector<128x128xbf16>, vector<64x128xf32> -> vector<64x128xf32>
    %11 = arith.addf %9, %10 : vector<64x128xf32>
    %12 = math.exp %11 : vector<64x128xf32>
    %c0_10 = arith.constant 0 : index
    %c0_11 = arith.constant 0 : index
    %13 = vector.load %arg4[%c0_10, %c0_11] : memref<64x128xbf16, #tpu.memory_space<vmem>>, vector<64x128xbf16>
    %c0_12 = arith.constant 0 : index
    %c0_13 = arith.constant 0 : index
    %14 = vector.load %arg5[%c0_12, %c0_13] : memref<64x128xbf16, #tpu.memory_space<vmem>>, vector<64x128xbf16>
    %cst_14 = arith.constant dense<0.000000e+00> : vector<64x128xf32>
    %15 = tpu.matmul %13, %3, %cst_14 {dimension_numbers = #tpu.dot_dimension_numbers<[1], [1], [0], [0], [0, 0, 1, 0], [], []>} : vector<64x128xbf16>, vector<128x128xbf16>, vector<64x128xf32> -> vector<64x128xf32>
    %cst_15 = arith.constant dense<0.000000e+00> : vector<64x128xf32>
    %16 = tpu.matmul %13, %4, %cst_15 {dimension_numbers = #tpu.dot_dimension_numbers<[1], [1], [0], [0], [0, 0, 1, 0], [], []>} : vector<64x128xbf16>, vector<128x128xbf16>, vector<64x128xf32> -> vector<64x128xf32>
    %17 = arith.addf %15, %16 : vector<64x128xf32>
    %cst_16 = arith.constant dense<0.000000e+00> : vector<64x128xf32>
    %18 = tpu.matmul %14, %3, %cst_16 {dimension_numbers = #tpu.dot_dimension_numbers<[1], [1], [0], [0], [0, 0, 1, 0], [], []>} : vector<64x128xbf16>, vector<128x128xbf16>, vector<64x128xf32> -> vector<64x128xf32>
    %19 = arith.addf %17, %18 : vector<64x128xf32>
    %20 = math.exp %19 : vector<64x128xf32>
    %c0_17 = arith.constant 0 : index
    %c0_18 = arith.constant 0 : index
    %21 = vector.load %arg8[%c0_17, %c0_18] : memref<64x128xf32, #tpu.memory_space<vmem>>, vector<64x128xf32>
    %22 = arith.addf %21, %12 : vector<64x128xf32>
    %c0_19 = arith.constant 0 : index
    %c0_20 = arith.constant 0 : index
    %23 = vector.load %arg8[%c0_19, %c0_20] : memref<64x128xf32, #tpu.memory_space<vmem>>, vector<64x128xf32>
    tpu.vector_store %arg8[%c0_19, %c0_20], %22 {strides = array<i32>} : memref<64x128xf32, #tpu.memory_space<vmem>>, vector<64x128xf32>,
    %c0_21 = arith.constant 0 : index
    %c0_22 = arith.constant 0 : index
    %24 = vector.load %arg9[%c0_21, %c0_22] : memref<64x128xf32, #tpu.memory_space<vmem>>, vector<64x128xf32>
    %25 = arith.addf %24, %20 : vector<64x128xf32>
    %c0_23 = arith.constant 0 : index
    %c0_24 = arith.constant 0 : index
    %26 = vector.load %arg9[%c0_23, %c0_24] : memref<64x128xf32, #tpu.memory_space<vmem>>, vector<64x128xf32>
    tpu.vector_store %arg9[%c0_23, %c0_24], %25 {strides = array<i32>} : memref<64x128xf32, #tpu.memory_space<vmem>>, vector<64x128xf32>,
    return
  }
  func.func @transform_0(%arg0: i32, %arg1: i32) -> (i32, i32) {
    %c0_i32 = arith.constant 0 : i32
    %c0_i32_0 = arith.constant 0 : i32
    return %arg0, %c0_i32 : i32, i32
  }
  func.func @transform_1(%arg0: i32, %arg1: i32) -> (i32, i32) {
    %c0_i32 = arith.constant 0 : i32
    %c0_i32_0 = arith.constant 0 : i32
    return %arg0, %c0_i32 : i32, i32
  }
  func.func @transform_2(%arg0: i32, %arg1: i32) -> (i32, i32) {
    %c0_i32 = arith.constant 0 : i32
    %c0_i32_0 = arith.constant 0 : i32
    return %arg0, %c0_i32 : i32, i32
  }
  func.func @transform_3(%arg0: i32, %arg1: i32) -> (i32, i32) {
    %c0_i32 = arith.constant 0 : i32
    %c0_i32_0 = arith.constant 0 : i32
    return %arg0, %c0_i32 : i32, i32
  }
  func.func @transform_4(%arg0: i32, %arg1: i32) -> (i32, i32) {
    %c0_i32 = arith.constant 0 : i32
    %c0_i32_0 = arith.constant 0 : i32
    return %arg1, %c0_i32 : i32, i32
  }
  func.func @transform_5(%arg0: i32, %arg1: i32) -> (i32, i32) {
    %c0_i32 = arith.constant 0 : i32
    %c0_i32_0 = arith.constant 0 : i32
    return %arg1, %c0_i32 : i32, i32
  }
  func.func @transform_6(%arg0: i32, %arg1: i32) -> (i32, i32) {
    %c0_i32 = arith.constant 0 : i32
    %c0_i32_0 = arith.constant 0 : i32
    return %arg0, %c0_i32 : i32, i32
  }
  func.func @transform_7(%arg0: i32, %arg1: i32) -> (i32, i32) {
    %c0_i32 = arith.constant 0 : i32
    %c0_i32_0 = arith.constant 0 : i32
    return %arg0, %c0_i32 : i32, i32
  }
}

</mosaic_0001>

<bundles_post_ra>
// kernel: tpu_custom_call.1
= control target key start
LH: loop header
LB: loop body
LE: loop exit
PB: predicated region body
PF: predicated region fallthrough
CT: control target
= control target key end

     0   :  { %13 = vsyncpa [#allocation3], 0  ;;  %s1657_s0 = inlined_call_operand.hbm [shape: bf16[64,128], index: 0, kind: input, shape index: {}]   ;;  %s1658_s1 = inlined_call_operand.hbm [shape: bf16[64,128], index: 1, kind: input, shape index: {}]   ;;  %s1659_s2 = inlined_call_operand.hbm [shape: bf16[64,128], index: 2, kind: input, shape index: {}]   ;;  %s1660_s3 = inlined_call_operand.hbm [shape: bf16[64,128], index: 3, kind: input, shape index: {}]   ;;  %s1661_s4 = inlined_call_operand.hbm [shape: bf16[128,128], index: 4, kind: input, shape index: {}]   ;;  %s1662_s5 = inlined_call_operand.hbm [shape: bf16[128,128], index: 5, kind: input, shape index: {}]   ;;  %s1663_s6 = inlined_call_operand.hbm [shape: f32[64,128], index: 6, kind: output, shape index: {0}]   ;;  %s1664_s7 = inlined_call_operand.hbm [shape: f32[64,128], index: 7, kind: output, shape index: {1}]  }
   0x1   :  { %14 = vsyncpa [#allocation6], 0 }
   0x2   :  { %15 = vsyncpa [#allocation9], 0 }
   0x3   :  { %16 = vsyncpa [#allocation12], 0 }
   0x4   :  { %17 = vsyncpa [#allocation4], 0 }
   0x5   :  { %18 = vsyncpa [#allocation15], 0  ;;  %s1453_s24 = smov [#allocation5]   ;;  %s1454_s26 = smov [#allocation8]  }
   0x6   :  { %s36_s25 = sshll.u32 %s1453_s24, 4  ;;  %s60_s27 = sshll.u32 %s1454_s26, 4  ;;  %s37_s25 = int_to_ptr.vmem [resolvable:$true] %s36_s25  ;;  %s1505_s27 = int_to_ptr.vmem [resolvable:$true] %s60_s27 }
   0x7   :  { %s1265_s30 = scalar_lea.hbm %s1658_s1, 512 }
   0x8   :  { %p1266_p0 = scmp.ne.s32.totalorder %s1658_s1, %s1265_s30  ;;  %p1269_p1 = scmp.lt.u32.totalorder %s1265_s30, %s1658_s1 }
   0xa   :  { %p1271_p2 = pnand %p1269_p1, %p1266_p0 }
   0xc   :  { %1274 = shalt.err (!%p1271_p2)
}
   0xd   :  { %s1275_s12 = scalar_lea.vmem %s37_s25, 512  ;;  %p1280_p4 = scmp.lt.s32.totalorder %s37_s25, %s37_s25 }
   0xe   :  { %p1276_p3 = scmp.ne.s32.totalorder %s37_s25, %s1275_s12  ;;  %p1281_p5 = scmp.lt.s32.totalorder %s1275_s12, %s1275_s12 }
  0x10   :  { %p1282_p6 = por %p1281_p5, %p1280_p4 }
  0x12   :  { %p1283_p7 = pnand %p1282_p6, %p1276_p3 }
  0x14   :  { %1286 = shalt.err (!%p1283_p7)
}
  0x15   :  { %s1455_s13 = smov 64   ;;  %s1456_s14 = smov 4  }
  0x16   :  { %42 = dma.hbm_to_vmem [thread:$0]  %s1658_s1, 512, %s37_s25, [#allocation6], %s1455_s13, %s1455_s13, %s1456_s14  }
  0x17   :  { %s1287_s19 = scalar_lea.hbm %s1660_s3, 512 }
  0x18   :  { %p1288_p8 = scmp.ne.s32.totalorder %s1660_s3, %s1287_s19  ;;  %p1291_p9 = scmp.lt.u32.totalorder %s1287_s19, %s1660_s3 }
  0x1a   :  { %p1293_p10 = pnand %p1291_p9, %p1288_p8 }
  0x1c   :  { %1296 = shalt.err (!%p1293_p10)
}
  0x1d   :  { %s1297_s24 = scalar_lea.vmem %s1505_s27, 512  ;;  %p1302_p12 = scmp.lt.s32.totalorder %s1505_s27, %s1505_s27 }
  0x1e   :  { %p1298_p11 = scmp.ne.s32.totalorder %s1505_s27, %s1297_s24  ;;  %p1303_p13 = scmp.lt.s32.totalorder %s1297_s24, %s1297_s24 }
  0x20   :  { %p1304_p0 = por %p1303_p13, %p1302_p12 }
  0x22   :  { %p1305_p1 = pnand %p1304_p0, %p1298_p11 }
  0x24   :  { %1308 = shalt.err (!%p1305_p1)
}
  0x25   :  { %66 = dma.hbm_to_vmem [thread:$0]  %s1660_s3, 512, %s1505_s27, [#allocation9], %s1455_s13, %s1455_s13, %s1456_s14  }
  0x26   :  { %s1457_s26 = smov [#allocation2]   ;;  %s1458_s29 = smov [#allocation7]  }
  0x27   :  { %s24_s28 = sshll.u32 %s1457_s26, 4  ;;  %s48_s30 = sshll.u32 %s1458_s29, 4  ;;  %s25_s28 = int_to_ptr.vmem [resolvable:$true] %s24_s28  ;;  %s1542_s30 = int_to_ptr.vmem [resolvable:$true] %s48_s30 }
  0x28   :  { %s1309_s10 = scalar_lea.hbm %s1657_s0, 512 }
  0x29   :  { %p1310_p2 = scmp.ne.s32.totalorder %s1657_s0, %s1309_s10  ;;  %p1313_p3 = scmp.lt.u32.totalorder %s1309_s10, %s1657_s0 }
  0x2b   :  { %p1315_p4 = pnand %p1313_p3, %p1310_p2 }
  0x2d   :  { %1318 = shalt.err (!%p1315_p4)
}
  0x2e   :  { %s1319_s3 = scalar_lea.vmem %s25_s28, 512  ;;  %p1324_p6 = scmp.lt.s32.totalorder %s25_s28, %s25_s28 }
  0x2f   :  { %p1320_p5 = scmp.ne.s32.totalorder %s25_s28, %s1319_s3  ;;  %p1325_p7 = scmp.lt.s32.totalorder %s1319_s3, %s1319_s3 }
  0x31   :  { %p1326_p8 = por %p1325_p7, %p1324_p6 }
  0x33   :  { %p1327_p9 = pnand %p1326_p8, %p1320_p5 }
  0x35   :  { %1330 = shalt.err (!%p1327_p9)
}
  0x36   :  { %30 = dma.hbm_to_vmem [thread:$0]  %s1657_s0, 512, %s25_s28, [#allocation3], %s1455_s13, %s1455_s13, %s1456_s14  }
  0x37   :  { %s1331_s20 = scalar_lea.hbm %s1659_s2, 512 }
  0x38   :  { %p1332_p10 = scmp.ne.s32.totalorder %s1659_s2, %s1331_s20  ;;  %p1335_p11 = scmp.lt.u32.totalorder %s1331_s20, %s1659_s2 }
  0x3a   :  { %p1337_p12 = pnand %p1335_p11, %p1332_p10 }
  0x3c   :  { %1340 = shalt.err (!%p1337_p12)
}
  0x3d   :  { %s1341_s1 = scalar_lea.vmem %s1542_s30, 512  ;;  %p1346_p0 = scmp.lt.s32.totalorder %s1542_s30, %s1542_s30 }
  0x3e   :  { %p1342_p13 = scmp.ne.s32.totalorder %s1542_s30, %s1341_s1  ;;  %p1347_p1 = scmp.lt.s32.totalorder %s1341_s1, %s1341_s1 }
  0x40   :  { %p1348_p2 = por %p1347_p1, %p1346_p0 }
  0x42   :  { %p1349_p3 = pnand %p1348_p2, %p1342_p13 }
  0x44   :  { %1352 = shalt.err (!%p1349_p3)
}
  0x45   :  { %54 = dma.hbm_to_vmem [thread:$0]  %s1659_s2, 512, %s1542_s30, [#allocation6], %s1455_s13, %s1455_s13, %s1456_s14  }
  0x46   :  { %s1459_s26 = smov [#allocation10]   ;;  %s1460_s29 = smov [#allocation11]  }
  0x47   :  { %s72_s28 = sshll.u32 %s1459_s26, 4  ;;  %s84_s8 = sshll.u32 %s1460_s29, 4  ;;  %s73_s28 = int_to_ptr.vmem [resolvable:$true] %s72_s28  ;;  %s1579_s8 = int_to_ptr.vmem [resolvable:$true] %s84_s8 }
  0x48   :  { %s1353_s11 = scalar_lea.hbm %s1661_s4, 1024 }
  0x49   :  { %p1354_p4 = scmp.ne.s32.totalorder %s1661_s4, %s1353_s11  ;;  %p1357_p5 = scmp.lt.u32.totalorder %s1353_s11, %s1661_s4 }
  0x4b   :  { %p1359_p6 = pnand %p1357_p5, %p1354_p4 }
  0x4d   :  { %1362 = shalt.err (!%p1359_p6)
}
  0x4e   :  { %s1363_s2 = scalar_lea.vmem %s73_s28, 1024  ;;  %p1368_p8 = scmp.lt.s32.totalorder %s73_s28, %s73_s28 }
  0x4f   :  { %p1364_p7 = scmp.ne.s32.totalorder %s73_s28, %s1363_s2  ;;  %p1369_p9 = scmp.lt.s32.totalorder %s1363_s2, %s1363_s2 }
  0x51   :  { %p1370_p10 = por %p1369_p9, %p1368_p8 }
  0x53   :  { %p1371_p11 = pnand %p1370_p10, %p1364_p7 }
  0x55   :  { %1374 = shalt.err (!%p1371_p11)
}
  0x56   :  { %78 = dma.hbm_to_vmem [thread:$0]  %s1661_s4, 1024, %s73_s28, [#allocation9], %s1455_s13, %s1455_s13, %s1456_s14  }
  0x57   :  { %s1375_s19 = scalar_lea.hbm %s1662_s5, 1024 }
  0x58   :  { %p1376_p12 = scmp.ne.s32.totalorder %s1662_s5, %s1375_s19  ;;  %p1379_p13 = scmp.lt.u32.totalorder %s1375_s19, %s1662_s5 }
  0x5a   :  { %p1381_p0 = pnand %p1379_p13, %p1376_p12 }
  0x5c   :  { %1384 = shalt.err (!%p1381_p0)
}
  0x5d   :  { %s1385_s24 = scalar_lea.vmem %s1579_s8, 1024  ;;  %p1390_p2 = scmp.lt.s32.totalorder %s1579_s8, %s1579_s8 }
  0x5e   :  { %p1386_p1 = scmp.ne.s32.totalorder %s1579_s8, %s1385_s24  ;;  %p1391_p3 = scmp.lt.s32.totalorder %s1385_s24, %s1385_s24 }
  0x60   :  { %p1392_p4 = por %p1391_p3, %p1390_p2 }
  0x62   :  { %p1393_p5 = pnand %p1392_p4, %p1386_p1 }
  0x64   :  { %1396 = shalt.err (!%p1393_p5)
}
  0x65   :  { %90 = dma.hbm_to_vmem [thread:$0]  %s1662_s5, 1024, %s1579_s8, [#allocation12], %s1455_s13, %s1455_s13, %s1456_s14  }
  0x66   :  { %1441 = dma.done.wait [#allocation3], 512  }
  0x67   :  { %1442 = vsyncadd [#allocation3], 4294966784 }
  0x68   :  { %1443 = dma.done.wait [#allocation6], 1024  }
  0x69   :  { %1444 = vsyncadd [#allocation6], 4294966272 }
  0x6a   :  { %1445 = dma.done.wait [#allocation9], 1536  }
  0x6b   :  { %1446 = vsyncadd [#allocation9], 4294965760 }
  0x6c   :  { %1447 = dma.done.wait [#allocation12], 1024  }
  0x6d   :  { %1448 = vsyncadd [#allocation12], 4294966272  ;;  %v1201_v0 = vld [vmem:[#allocation11] sm:$0xff]   ;;  %v1202_v1 = vld [vmem:[#allocation11 + $0x8] sm:$0xff]   ;;  %s1461_s5 = smov [#allocation13]   ;;  %s1462_s14 = smov [#allocation14]  }
  0x6e   :  { %1012 = vmatprep.subr.bf16.mxu0 %v1201_v0  ;;  %1084 = vmatprep.subr.bf16.mxu1 %v1201_v0  ;;  %v1203_v2 = vld [vmem:[#allocation11 + $0x10] sm:$0xff]   ;;  %v1209_v3 = vld [vmem:[#allocation2] sm:$0xff]   ;;  %v1204_v5 = vld [vmem:[#allocation11 + $0x18] sm:$0xff]   ;;  %s877_s13 = sshll.u32 %s1461_s5, 4  ;;  %s889_s0 = sshll.u32 %s1462_s14, 4  ;;  %s878_s13 = int_to_ptr.vmem [resolvable:$true] %s877_s13  ;;  %s1626_s0 = int_to_ptr.vmem [resolvable:$true] %s889_s0 }
  0x6f   :  { %1013 = vmatpush3.bf16.xpose.msra.mxu0 %v1201_v0  ;;  %1085 = vmatpush3.bf16.xpose.msra.mxu1 %v1201_v0  ;;  %v1211_v4 = vld [vmem:[#allocation7] sm:$0xff]   ;;  %v1206_v7 = vld [vmem:[#allocation11 + $0x28] sm:$0xff]   ;;  %v1207_v8 = vld [vmem:[#allocation11 + $0x30] sm:$0xff]   ;;  %s1397_s25 = scalar_lea.vmem %s878_s13, 1024  ;;  %p1402_p7 = scmp.lt.s32.totalorder %s878_s13, %s878_s13 }
  0x70   :  { %1014 = vmatprep.subr.bf16.mxu0 %v1202_v1  ;;  %1086 = vmatprep.subr.bf16.mxu1 %v1202_v1  ;;  %v1205_v6 = vld [vmem:[#allocation11 + $0x20] sm:$0xff]   ;;  %v1208_v9 = vld [vmem:[#allocation11 + $0x38] sm:$0xff]   ;;  %v1212_v11 = vld [vmem:[#allocation2 + $0x8] sm:$0xff]   ;;  %p1398_p6 = scmp.ne.s32.totalorder %s878_s13, %s1397_s25  ;;  %p1403_p8 = scmp.lt.s32.totalorder %s1397_s25, %s1397_s25 }
  0x71   :  { %1028 = vmatprep.mubr.bf16.mxu0 %v1209_v3  ;;  %1100 = vmatprep.mubr.bf16.mxu1 %v1211_v4  ;;  %v1210_v10 = vld [vmem:[#allocation10] sm:$0xff]   ;;  %v1213_v12 = vld [vmem:[#allocation7 + $0x8] sm:$0xff]   ;;  %v1220_v14 = vld [vmem:[#allocation2 + $0x10] sm:$0xff]  }
  0x72   :  { %v1616_v13 = vld [vmem:[#allocation10 + $0x8] sm:$0xff]   ;;  %v1222_v15 = vld [vmem:[#allocation7 + $0x10] sm:$0xff]   ;;  %v1223_v16 = vld [vmem:[#allocation2 + $0x18] sm:$0xff]   ;;  %p1404_p9 = por %p1403_p8, %p1402_p7 }
  0x73   :  { %v1224_v17 = vld [vmem:[#allocation7 + $0x18] sm:$0xff]   ;;  %v1215_v18 = vld [vmem:[#allocation10 + $0x10] sm:$0xff]   ;;  %v1217_v20 = vld [vmem:[#allocation10 + $0x20] sm:$0xff]  }
  0x74   :  { %v1216_v19 = vld [vmem:[#allocation10 + $0x18] sm:$0xff]   ;;  %v1218_v21 = vld [vmem:[#allocation10 + $0x28] sm:$0xff]   ;;  %v1219_v22 = vld [vmem:[#allocation10 + $0x30] sm:$0xff]   ;;  %p1405_p10 = pnand %p1404_p9, %p1398_p6 }
  0x75   :  { %v1221_v23 = vld [vmem:[#allocation10 + $0x38] sm:$0xff]   ;;  %v1225_v24 = vld [vmem:[#allocation5] sm:$0xff]   ;;  %v1227_v26 = vld [vmem:[#allocation5 + $0x8] sm:$0xff]  }
  0x76   :  { %v1226_v25 = vld [vmem:[#allocation8] sm:$0xff]   ;;  %v1228_v27 = vld [vmem:[#allocation8 + $0x8] sm:$0xff]   ;;  %v1229_v28 = vld [vmem:[#allocation5 + $0x10] sm:$0xff]  }
  0x77   :  { %1015 = vmatpush3.bf16.xpose.msra.mxu0 %v1202_v1  ;;  %1087 = vmatpush3.bf16.xpose.msra.mxu1 %v1202_v1  ;;  %v1230_v29 = vld [vmem:[#allocation8 + $0x10] sm:$0xff]   ;;  %v1231_v30 = vld [vmem:[#allocation5 + $0x18] sm:$0xff]  }
  0x78   :  { %1016 = vmatprep.subr.bf16.mxu0 %v1203_v2  ;;  %1088 = vmatprep.subr.bf16.mxu1 %v1203_v2  ;;  %v1232_v31 = vld [vmem:[#allocation8 + $0x18] sm:$0xff]  }
  0x7f   :  { %1017 = vmatpush3.bf16.xpose.msra.mxu0 %v1203_v2  ;;  %1089 = vmatpush3.bf16.xpose.msra.mxu1 %v1203_v2 }
  0x80   :  { %1018 = vmatprep.subr.bf16.mxu0 %v1204_v5  ;;  %1090 = vmatprep.subr.bf16.mxu1 %v1204_v5 }
  0x87   :  { %1019 = vmatpush3.bf16.xpose.msra.mxu0 %v1204_v5  ;;  %1091 = vmatpush3.bf16.xpose.msra.mxu1 %v1204_v5 }
  0x88   :  { %1020 = vmatprep.subr.bf16.mxu0 %v1205_v6  ;;  %1092 = vmatprep.subr.bf16.mxu1 %v1205_v6 }
  0x8f   :  { %1021 = vmatpush3.bf16.xpose.msra.mxu0 %v1205_v6  ;;  %1093 = vmatpush3.bf16.xpose.msra.mxu1 %v1205_v6 }
  0x90   :  { %1022 = vmatprep.subr.bf16.mxu0 %v1206_v7  ;;  %1094 = vmatprep.subr.bf16.mxu1 %v1206_v7 }
  0x97   :  { %1023 = vmatpush3.bf16.xpose.msra.mxu0 %v1206_v7  ;;  %1095 = vmatpush3.bf16.xpose.msra.mxu1 %v1206_v7 }
  0x98   :  { %1024 = vmatprep.subr.bf16.mxu0 %v1207_v8  ;;  %1096 = vmatprep.subr.bf16.mxu1 %v1207_v8 }
  0x9f   :  { %1025 = vmatpush3.bf16.xpose.msra.mxu0 %v1207_v8  ;;  %1097 = vmatpush3.bf16.xpose.msra.mxu1 %v1207_v8 }
  0xa0   :  { %1026 = vmatprep.subr.bf16.mxu0 %v1208_v9  ;;  %1098 = vmatprep.subr.bf16.mxu1 %v1208_v9 }
  0xa7   :  { %1027 = vmatpush3.bf16.xpose.msra.mxu0 %v1208_v9  ;;  %1099 = vmatpush3.bf16.xpose.msra.mxu1 %v1208_v9 }
  0xa8   :  { %1036 = vmatprep.subr.bf16.mxu0 %v1210_v10  ;;  %1108 = vmatprep.subr.bf16.mxu1 %v1210_v10 }
  0xae   :  { %1029 = vmatmul.mubr.bf16.vlgmr.msra.gmra.mrb[0].mxu0 %v1212_v11  ;;  %1101 = vmatmul.mubr.bf16.vlgmr.msra.gmra.mrb[0].mxu1 %v1213_v12 }
  0xaf   :  { %1037 = vmatpush3.bf16.xpose.msra.mxu0 %v1210_v10  ;;  %1109 = vmatpush3.bf16.xpose.msra.mxu1 %v1210_v10 }
  0xb0   :  { %1038 = vmatprep.subr.bf16.mxu0 %v1616_v13  ;;  %1110 = vmatprep.subr.bf16.mxu1 %v1616_v13 }
  0xb1   :  { %1032 = vmatprep.mubr.bf16.mxu0 %v1220_v14  ;;  %1104 = vmatprep.mubr.bf16.mxu1 %v1222_v15 }
  0xb6   :  { %1033 = vmatmul.mubr.bf16.gmra.mrb[4].mxu0 %v1223_v16  ;;  %1105 = vmatmul.mubr.bf16.gmra.mrb[4].mxu1 %v1224_v17 }
  0xb7   :  { %1039 = vmatpush3.bf16.xpose.msra.mxu0 %v1616_v13  ;;  %1111 = vmatpush3.bf16.xpose.msra.mxu1 %v1616_v13 }
  0xb8   :  { %1040 = vmatprep.subr.bf16.mxu0 %v1215_v18  ;;  %1112 = vmatprep.subr.bf16.mxu1 %v1215_v18 }
  0xb9   :  { %1052 = vmatprep.mubr.bf16.mxu0 %v1209_v3  ;;  %1124 = vmatprep.mubr.bf16.mxu1 %v1211_v4 }
  0xbf   :  { %1041 = vmatpush3.bf16.xpose.msra.mxu0 %v1215_v18  ;;  %1113 = vmatpush3.bf16.xpose.msra.mxu1 %v1215_v18 }
  0xc0   :  { %1042 = vmatprep.subr.bf16.mxu0 %v1216_v19  ;;  %1114 = vmatprep.subr.bf16.mxu1 %v1216_v19 }
  0xc7   :  { %1043 = vmatpush3.bf16.xpose.msra.mxu0 %v1216_v19  ;;  %1115 = vmatpush3.bf16.xpose.msra.mxu1 %v1216_v19 }
  0xc8   :  { %1044 = vmatprep.subr.bf16.mxu0 %v1217_v20  ;;  %1116 = vmatprep.subr.bf16.mxu1 %v1217_v20 }
  0xcf   :  { %1045 = vmatpush3.bf16.xpose.msra.mxu0 %v1217_v20  ;;  %1117 = vmatpush3.bf16.xpose.msra.mxu1 %v1217_v20 }
  0xd0   :  { %1046 = vmatprep.subr.bf16.mxu0 %v1218_v21  ;;  %1118 = vmatprep.subr.bf16.mxu1 %v1218_v21 }
  0xd7   :  { %1047 = vmatpush3.bf16.xpose.msra.mxu0 %v1218_v21  ;;  %1119 = vmatpush3.bf16.xpose.msra.mxu1 %v1218_v21 }
  0xd8   :  { %1048 = vmatprep.subr.bf16.mxu0 %v1219_v22  ;;  %1120 = vmatprep.subr.bf16.mxu1 %v1219_v22 }
  0xdf   :  { %1049 = vmatpush3.bf16.xpose.msra.mxu0 %v1219_v22  ;;  %1121 = vmatpush3.bf16.xpose.msra.mxu1 %v1219_v22 }
  0xe0   :  { %1050 = vmatprep.subr.bf16.mxu0 %v1221_v23  ;;  %1122 = vmatprep.subr.bf16.mxu1 %v1221_v23 }
  0xe7   :  { %1051 = vmatpush3.bf16.xpose.msra.mxu0 %v1221_v23  ;;  %1123 = vmatpush3.bf16.xpose.msra.mxu1 %v1221_v23 }
  0xe8   :  { %1060 = vmatprep.subr.bf16.mxu0 %v1210_v10  ;;  %1132 = vmatprep.subr.bf16.mxu1 %v1210_v10 }
  0xee   :  { %1053 = vmatmul.mubr.bf16.vlgmr.msra.gmra.mrb[0].mxu0 %v1212_v11  ;;  %1125 = vmatmul.mubr.bf16.vlgmr.msra.gmra.mrb[0].mxu1 %v1213_v12 }
  0xef   :  { %1061 = vmatpush3.bf16.xpose.msra.mxu0 %v1210_v10  ;;  %1133 = vmatpush3.bf16.xpose.msra.mxu1 %v1210_v10 }
  0xf0   :  { %1062 = vmatprep.subr.bf16.mxu0 %v1616_v13  ;;  %1134 = vmatprep.subr.bf16.mxu1 %v1616_v13 }
  0xf1   :  { %1056 = vmatprep.mubr.bf16.mxu0 %v1220_v14  ;;  %1128 = vmatprep.mubr.bf16.mxu1 %v1222_v15 }
  0xf6   :  { %1057 = vmatmul.mubr.bf16.gmra.mrb[4].mxu0 %v1223_v16  ;;  %1129 = vmatmul.mubr.bf16.gmra.mrb[4].mxu1 %v1224_v17 }
  0xf7   :  { %1063 = vmatpush3.bf16.xpose.msra.mxu0 %v1616_v13  ;;  %1135 = vmatpush3.bf16.xpose.msra.mxu1 %v1616_v13 }
  0xf8   :  { %1064 = vmatprep.subr.bf16.mxu0 %v1215_v18  ;;  %1136 = vmatprep.subr.bf16.mxu1 %v1215_v18 }
  0xf9   :  { %1076 = vmatprep.mubr.bf16.mxu0 %v1225_v24  ;;  %1148 = vmatprep.mubr.bf16.mxu1 %v1226_v25 }
  0xff   :  { %1065 = vmatpush3.bf16.xpose.msra.mxu0 %v1215_v18  ;;  %1137 = vmatpush3.bf16.xpose.msra.mxu1 %v1215_v18 }
 0x100   :  { %1066 = vmatprep.subr.bf16.mxu0 %v1216_v19  ;;  %1138 = vmatprep.subr.bf16.mxu1 %v1216_v19 }
 0x107   :  { %1067 = vmatpush3.bf16.xpose.msra.mxu0 %v1216_v19  ;;  %1139 = vmatpush3.bf16.xpose.msra.mxu1 %v1216_v19 }
 0x108   :  { %1068 = vmatprep.subr.bf16.mxu0 %v1217_v20  ;;  %1140 = vmatprep.subr.bf16.mxu1 %v1217_v20 }
 0x10f   :  { %1069 = vmatpush3.bf16.xpose.msra.mxu0 %v1217_v20  ;;  %1141 = vmatpush3.bf16.xpose.msra.mxu1 %v1217_v20 }
 0x110   :  { %1070 = vmatprep.subr.bf16.mxu0 %v1218_v21  ;;  %1142 = vmatprep.subr.bf16.mxu1 %v1218_v21 }
 0x117   :  { %1071 = vmatpush3.bf16.xpose.msra.mxu0 %v1218_v21  ;;  %1143 = vmatpush3.bf16.xpose.msra.mxu1 %v1218_v21 }
 0x118   :  { %1072 = vmatprep.subr.bf16.mxu0 %v1219_v22  ;;  %1144 = vmatprep.subr.bf16.mxu1 %v1219_v22 }
 0x11f   :  { %1073 = vmatpush3.bf16.xpose.msra.mxu0 %v1219_v22  ;;  %1145 = vmatpush3.bf16.xpose.msra.mxu1 %v1219_v22 }
 0x120   :  { %1074 = vmatprep.subr.bf16.mxu0 %v1221_v23  ;;  %1146 = vmatprep.subr.bf16.mxu1 %v1221_v23 }
 0x127   :  { %1075 = vmatpush3.bf16.xpose.msra.mxu0 %v1221_v23  ;;  %1147 = vmatpush3.bf16.xpose.msra.mxu1 %v1221_v23 }
 0x12e   :  { %1077 = vmatmul.mubr.bf16.vlgmr.msra.gmra.mrb[0].mxu0 %v1227_v26  ;;  %1149 = vmatmul.mubr.bf16.vlgmr.msra.gmra.mrb[0].mxu1 %v1228_v27 }
 0x12f   :  { %1080 = vmatprep.mubr.bf16.mxu0 %v1229_v28  ;;  %1152 = vmatprep.mubr.bf16.mxu1 %v1230_v29 }
 0x136   :  { %1081 = vmatmul.mubr.bf16.gmra.mrb[4].mxu0 %v1231_v30  ;;  %1153 = vmatmul.mubr.bf16.gmra.mrb[4].mxu1 %v1232_v31 }
 0x201   :  { %v1078_v32 = vpop.f32.mrb[0].mxu0  ;;  %v1150_v33 = vpop.f32.mrb[0].mxu1 }
 0x202   :  { %v529_v34 = vmul.f32 1.442695, %v1078_v32  ;;  %v812_v35 = vmul.f32 1.442695, %v1150_v33  ;;  %v486_v36 = vpop.f32.mrb[1].mxu0  ;;  %v769_v37 = vpop.f32.mrb[1].mxu1 }
 0x203   :  { %v525_v38 = vmul.f32 1.442695, %v486_v36  ;;  %v808_v39 = vmul.f32 1.442695, %v769_v37  ;;  %v1079_v40 = vpop.f32.mrb[2].mxu0  ;;  %v1151_v41 = vpop.f32.mrb[2].mxu1 }
 0x204   :  { %1233 = vpow2.f32 %v529_v34  ;;  %v531_v42 = vmul.f32 1.442695, %v1079_v40  ;;  %v489_v43 = vpop.f32.mrb[3].mxu0  ;;  %v772_v44 = vpop.f32.mrb[3].mxu1  ;;  %v814_v45 = vmul.f32 1.442695, %v1151_v41 }
 0x205   :  { %1235 = vpow2.f32 %v812_v35  ;;  %v527_v46 = vmul.f32 1.442695, %v489_v43  ;;  %v810_v47 = vmul.f32 1.442695, %v772_v44 }
 0x206   :  { %1237 = vpow2.f32 %v525_v38 }
 0x207   :  { %1239 = vpow2.f32 %v808_v39 }
 0x208   :  { %1241 = vpow2.f32 %v531_v42 }
 0x209   :  { %1243 = vpow2.f32 %v814_v45  ;;  %v1082_v48 = vpop.f32.mrb[4].mxu0  ;;  %v1154_v49 = vpop.f32.mrb[4].mxu1 }
 0x20a   :  { %1245 = vpow2.f32 %v527_v46  ;;  %v537_v50 = vmul.f32 1.442695, %v1082_v48  ;;  %v820_v51 = vmul.f32 1.442695, %v1154_v49  ;;  %v502_v52 = vpop.f32.mrb[5].mxu0  ;;  %v785_v53 = vpop.f32.mrb[5].mxu1 }
 0x20b   :  { %1247 = vpow2.f32 %v810_v47  ;;  %v533_v54 = vmul.f32 1.442695, %v502_v52  ;;  %v816_v55 = vmul.f32 1.442695, %v785_v53  ;;  %v1083_v56 = vpop.f32.mrb[6].mxu0  ;;  %v1155_v57 = vpop.f32.mrb[6].mxu1 }
 0x20c   :  { %1249 = vpow2.f32 %v537_v50  ;;  %v539_v58 = vmul.f32 1.442695, %v1083_v56  ;;  %v505_v59 = vpop.f32.mrb[7].mxu0  ;;  %v788_v60 = vpop.f32.mrb[7].mxu1  ;;  %v822_v61 = vmul.f32 1.442695, %v1155_v57 }
 0x20d   :  { %1251 = vpow2.f32 %v820_v51  ;;  %v535_v63 = vmul.f32 1.442695, %v505_v59  ;;  %v818_v1 = vmul.f32 1.442695, %v788_v60 }
 0x20e   :  { %v1234_v62 = vpop.eup %1233  ;;  %1253 = vpow2.f32 %v533_v54 }
 0x20f   :  { %v1236_v0 = vpop.eup %1235  ;;  %1255 = vpow2.f32 %v816_v55  ;;  %842 = vst [vmem:[#allocation13 + $0x10] sm:$0xff] %v1234_v62 }
 0x210   :  { %v1238_v2 = vpop.eup %1237  ;;  %1257 = vpow2.f32 %v539_v58  ;;  %866 = vst [vmem:[#allocation14 + $0x10] sm:$0xff] %v1236_v0 }
 0x211   :  { %v1240_v3 = vpop.eup %1239  ;;  %1259 = vpow2.f32 %v822_v61  ;;  %840 = vst [vmem:[#allocation13] sm:$0xff] %v1238_v2 }
 0x212   :  { %v1242_v4 = vpop.eup %1241  ;;  %1261 = vpow2.f32 %v535_v63  ;;  %864 = vst [vmem:[#allocation14] sm:$0xff] %v1240_v3 }
 0x213   :  { %v1244_v5 = vpop.eup %1243  ;;  %1263 = vpow2.f32 %v818_v1  ;;  %843 = vst [vmem:[#allocation13 + $0x18] sm:$0xff] %v1242_v4 }
 0x214   :  { %v1246_v6 = vpop.eup %1245  ;;  %867 = vst [vmem:[#allocation14 + $0x18] sm:$0xff] %v1244_v5 }
 0x215   :  { %v1248_v7 = vpop.eup %1247  ;;  %841 = vst [vmem:[#allocation13 + $0x8] sm:$0xff] %v1246_v6 }
 0x216   :  { %v1250_v8 = vpop.eup %1249  ;;  %865 = vst [vmem:[#allocation14 + $0x8] sm:$0xff] %v1248_v7 }
 0x217   :  { %v1252_v9 = vpop.eup %1251  ;;  %846 = vst [vmem:[#allocation13 + $0x30] sm:$0xff] %v1250_v8 }
 0x218   :  { %v1254_v10 = vpop.eup %1253  ;;  %870 = vst [vmem:[#allocation14 + $0x30] sm:$0xff] %v1252_v9 }
 0x219   :  { %v1256_v11 = vpop.eup %1255  ;;  %844 = vst [vmem:[#allocation13 + $0x20] sm:$0xff] %v1254_v10 }
 0x21a   :  { %v1258_v12 = vpop.eup %1257  ;;  %868 = vst [vmem:[#allocation14 + $0x20] sm:$0xff] %v1256_v11 }
 0x21b   :  { %v1260_v13 = vpop.eup %1259  ;;  %847 = vst [vmem:[#allocation13 + $0x38] sm:$0xff] %v1258_v12 }
 0x21c   :  { %v1262_v14 = vpop.eup %1261  ;;  %871 = vst [vmem:[#allocation14 + $0x38] sm:$0xff] %v1260_v13 }
 0x21d   :  { %v1264_v15 = vpop.eup %1263  ;;  %845 = vst [vmem:[#allocation13 + $0x28] sm:$0xff] %v1262_v14 }
 0x21e   :  { %869 = vst [vmem:[#allocation14 + $0x28] sm:$0xff] %v1264_v15 }
 0x21f   :  { %1408 = shalt.err (!%p1405_p10)
}
 0x220   :  { %s1409_s29 = scalar_lea.hbm %s1663_s6, 1024 }
 0x221   :  { %p1410_p11 = scmp.ne.s32.totalorder %s1663_s6, %s1409_s29  ;;  %p1413_p12 = scmp.lt.u32.totalorder %s1409_s29, %s1663_s6 }
 0x223   :  { %p1415_p13 = pnand %p1413_p12, %p1410_p11 }
 0x225   :  { %1418 = shalt.err (!%p1415_p13)
}
 0x226   :  { %s1463_s12 = smov 128   ;;  %s1464_s15 = smov 8  }
 0x227   :  { %883 = dma.vmem_to_hbm [thread:$0]  %s878_s13, 1024, %s1663_s6, [#allocation4], %s1463_s12, %s1463_s12, %s1464_s15  }
 0x228   :  { %s1419_s2 = scalar_lea.vmem %s1626_s0, 1024  ;;  %p1424_p1 = scmp.lt.s32.totalorder %s1626_s0, %s1626_s0 }
 0x229   :  { %p1420_p0 = scmp.ne.s32.totalorder %s1626_s0, %s1419_s2  ;;  %p1425_p2 = scmp.lt.s32.totalorder %s1419_s2, %s1419_s2 }
 0x22b   :  { %p1426_p3 = por %p1425_p2, %p1424_p1 }
 0x22d   :  { %p1427_p4 = pnand %p1426_p3, %p1420_p0 }
 0x22f   :  { %1430 = shalt.err (!%p1427_p4)
}
 0x230   :  { %s1431_s17 = scalar_lea.hbm %s1664_s7, 1024 }
 0x231   :  { %p1432_p5 = scmp.ne.s32.totalorder %s1664_s7, %s1431_s17  ;;  %p1435_p6 = scmp.lt.u32.totalorder %s1431_s17, %s1664_s7 }
 0x233   :  { %p1437_p7 = pnand %p1435_p6, %p1432_p5 }
 0x235   :  { %1440 = shalt.err (!%p1437_p7)
}
 0x236   :  { %895 = dma.vmem_to_hbm [thread:$0]  %s1626_s0, 1024, %s1664_s7, [#allocation15], %s1463_s12, %s1463_s12, %s1464_s15  }
 0x237   :  { %1449 = dma.done.wait [#allocation4], 1024  }
 0x238   :  { %1450 = vsyncadd [#allocation4], 4294966272 }
 0x239   :  { %1451 = dma.done.wait [#allocation15], 1024  }
 0x23a   :  { %1452 = vsyncadd [#allocation15], 4294966272 }
 0x23b   :  { %902 = vsyncpa [#allocation3], 1 }
 0x23c   :  { %903 = vsyncpa [#allocation6], 1 }
 0x23d   :  { %904 = vsyncpa [#allocation9], 1 }
 0x23e   :  { %905 = vsyncpa [#allocation12], 1 }
 0x23f   :  { %906 = vsyncpa [#allocation4], 1 }
 0x240   :  { %907 = vsyncpa [#allocation15], 1 }

</bundles_post_ra>
